<compile_context>
chip_gen: v7x
topology: tpu7x:2x2x1
jax: 0.10.0
libtpu: 0.0.40
codegen_flags: <defaults>
</compile_context>

<pallas_src>
import functools

import jax
import jax.numpy as jnp
from jax import lax
from jax.experimental import pallas as pl
from jax.experimental.pallas import tpu as pltpu

_EPS = 1e-5
_LANE = 128


def _round_up(x, m):
    return (x + m - 1) // m * m


def _tpu_vmem_limit_bytes():
    """Generation-aware scoped-VMEM limit: ~48 MiB on v7x (64 MiB physical),
    ~96 MiB on v5e/v6e (128 MiB physical); conservative fallback otherwise."""
    try:
        cap = int(pltpu.get_tpu_info().vmem_capacity_bytes)
        return min(int(cap * 3 // 4), 96 * 1024 * 1024)
    except Exception:  # pragma: no cover - query unavailable
        return 32 * 1024 * 1024


_VMEM_LIMIT = _tpu_vmem_limit_bytes()
_VMEM_BUDGET = _VMEM_LIMIT - 4 * 1024 * 1024  # headroom for internal scratch


def _pad2(a, rows, cols):
    r, c = a.shape
    if r == rows and c == cols:
        return a
    return jnp.pad(a, ((0, rows - r), (0, cols - c)))


def _tile_sizes(M, Kp, C, extra_k=0):
    """Pick (tm, tn) for a full-K matmul tile, shrinking until the
    double-buffered working set fits the per-generation VMEM budget."""
    tn = min(512, _round_up(C, _LANE))
    tm = min(512, _round_up(M, 16))

    def working_set(tm_, tn_):
        cols = 2 * tm_ * Kp * 2                 # bf16 cols, double-buffered
        wgt = 2 * Kp * tn_ * 2                  # bf16 weight panel
        outb = 2 * tm_ * tn_ * 4                # f32 output tile
        res = 2 * tm_ * tn_ * 2                 # bf16 residual tile
        proj = 2 * (tm_ * extra_k * 2 + extra_k * tn_ * 2)  # shortcut operands
        bias = 2 * tn_ * 4
        return cols + wgt + outb + res + proj + bias

    while tm > 64 and working_set(tm, tn) > _VMEM_BUDGET:
        tm //= 2
    while tn > _LANE and working_set(tm, tn) > _VMEM_BUDGET:
        tn = max(_LANE, (tn // 2) // _LANE * _LANE)
    return tm, tn


def _compiler_params():
    return pltpu.CompilerParams(
        dimension_semantics=("parallel", "parallel"),
        vmem_limit_bytes=_VMEM_LIMIT)


# ----------------------------- Pallas kernels ------------------------------

def _mm_bias_kernel(x_ref, w_ref, b_ref, o_ref, *, relu):
    """Single full-K matmul per output tile; folded-BN bias, optional ReLU."""
    acc = jnp.dot(x_ref[...], w_ref[...], preferred_element_type=jnp.float32)
    out = acc + b_ref[...]
    if relu:
        out = jnp.maximum(out, 0.0)
    o_ref[...] = out.astype(o_ref.dtype)


def _mm_bias_res_relu_kernel(x_ref, w_ref, b_ref, r_ref, o_ref):
    """conv2 + bn2 + identity residual (bf16 stream) + ReLU."""
    acc = jnp.dot(x_ref[...], w_ref[...], preferred_element_type=jnp.float32)
    out = acc + b_ref[...] + r_ref[...].astype(jnp.float32)
    o_ref[...] = jnp.maximum(out, 0.0).astype(o_ref.dtype)


def _mm_bias_proj_relu_kernel(x_ref, w_ref, b_ref, xs_ref, ws_ref, o_ref):
    """conv2 + bn2 with the fused 1x1-conv + bn projection shortcut
    (second dot into the same f32 accumulator), combined bias, ReLU."""
    acc = jnp.dot(x_ref[...], w_ref[...], preferred_element_type=jnp.float32)
    acc = acc + jnp.dot(xs_ref[...], ws_ref[...],
                        preferred_element_type=jnp.float32)
    out = acc + b_ref[...]
    o_ref[...] = jnp.maximum(out, 0.0).astype(o_ref.dtype)


# --------------------------- pallas_call wrappers ---------------------------

def matmul_bn_act(cols, w_scaled, bias, *, relu, out_dtype):
    M, K = cols.shape
    C = w_scaled.shape[1]
    Kp = _round_up(K, _LANE)
    tm, tn = _tile_sizes(M, Kp, C)
    Mp, Cp = _round_up(M, tm), _round_up(C, tn)
    cols_p = _pad2(cols.astype(jnp.bfloat16), Mp, Kp)
    w_p = _pad2(w_scaled.astype(jnp.bfloat16), Kp, Cp)
    b_p = _pad2(bias.astype(jnp.float32).reshape(1, C), 1, Cp)
    grid = (Mp // tm, Cp // tn)
    out = pl.pallas_call(
        functools.partial(_mm_bias_kernel, relu=relu),
        out_shape=jax.ShapeDtypeStruct((Mp, Cp), out_dtype),
        grid_spec=pltpu.PrefetchScalarGridSpec(
            num_scalar_prefetch=0,
            grid=grid,
            in_specs=[
                pl.BlockSpec((tm, Kp), lambda i, j: (i, 0)),
                pl.BlockSpec((Kp, tn), lambda i, j: (0, j)),
                pl.BlockSpec((1, tn), lambda i, j: (0, j)),
            ],
            out_specs=pl.BlockSpec((tm, tn), lambda i, j: (i, j)),
        ),
        compiler_params=_compiler_params(),
    )(cols_p, w_p, b_p)
    return out[:M, :C]


def matmul_bn_add_relu_identity(cols, w_scaled, bias, res, *, out_dtype):
    M, K = cols.shape
    C = w_scaled.shape[1]
    Kp = _round_up(K, _LANE)
    tm, tn = _tile_sizes(M, Kp, C)
    Mp, Cp = _round_up(M, tm), _round_up(C, tn)
    cols_p = _pad2(cols.astype(jnp.bfloat16), Mp, Kp)
    w_p = _pad2(w_scaled.astype(jnp.bfloat16), Kp, Cp)
    b_p = _pad2(bias.astype(jnp.float32).reshape(1, C), 1, Cp)
    r_p = _pad2(res.astype(jnp.bfloat16), Mp, Cp)   # residual stream in bf16
    grid = (Mp // tm, Cp // tn)
    out = pl.pallas_call(
        _mm_bias_res_relu_kernel,
        out_shape=jax.ShapeDtypeStruct((Mp, Cp), out_dtype),
        grid_spec=pltpu.PrefetchScalarGridSpec(
            num_scalar_prefetch=0,
            grid=grid,
            in_specs=[
                pl.BlockSpec((tm, Kp), lambda i, j: (i, 0)),
                pl.BlockSpec((Kp, tn), lambda i, j: (0, j)),
                pl.BlockSpec((1, tn), lambda i, j: (0, j)),
                pl.BlockSpec((tm, tn), lambda i, j: (i, j)),
            ],
            out_specs=pl.BlockSpec((tm, tn), lambda i, j: (i, j)),
        ),
        compiler_params=_compiler_params(),
    )(cols_p, w_p, b_p, r_p)
    return out[:M, :C]


def matmul_bn_proj_add_relu(cols, w_scaled, bias_total, xs, ws_scaled, *,
                            out_dtype):
    M, K = cols.shape
    C = w_scaled.shape[1]
    Cin = xs.shape[1]
    Kp = _round_up(K, _LANE)
    Kin = _round_up(Cin, _LANE)
    tm, tn = _tile_sizes(M, Kp, C, extra_k=Kin)
    Mp, Cp = _round_up(M, tm), _round_up(C, tn)
    cols_p = _pad2(cols.astype(jnp.bfloat16), Mp, Kp)
    w_p = _pad2(w_scaled.astype(jnp.bfloat16), Kp, Cp)
    b_p = _pad2(bias_total.astype(jnp.float32).reshape(1, C), 1, Cp)
    xs_p = _pad2(xs.astype(jnp.bfloat16), Mp, Kin)
    ws_p = _pad2(ws_scaled.astype(jnp.bfloat16), Kin, Cp)
    grid = (Mp // tm, Cp // tn)
    out = pl.pallas_call(
        _mm_bias_proj_relu_kernel,
        out_shape=jax.ShapeDtypeStruct((Mp, Cp), out_dtype),
        grid_spec=pltpu.PrefetchScalarGridSpec(
            num_scalar_prefetch=0,
            grid=grid,
            in_specs=[
                pl.BlockSpec((tm, Kp), lambda i, j: (i, 0)),
                pl.BlockSpec((Kp, tn), lambda i, j: (0, j)),
                pl.BlockSpec((1, tn), lambda i, j: (0, j)),
                pl.BlockSpec((tm, Kin), lambda i, j: (i, 0)),
                pl.BlockSpec((Kin, tn), lambda i, j: (0, j)),
            ],
            out_specs=pl.BlockSpec((tm, tn), lambda i, j: (i, j)),
        ),
        compiler_params=_compiler_params(),
    )(cols_p, w_p, b_p, xs_p, ws_p)
    return out[:M, :C]


# ------------------------------- glue (JAX) --------------------------------

def _im2col_3x3(x_nhwc, stride):
    """3x3, pad=1 patches. Returns (N*Ho*Wo, 9*C) with (kh, kw, cin) order."""
    N, H, W, C = x_nhwc.shape
    Ho = (H + 2 - 3) // stride + 1
    Wo = (W + 2 - 3) // stride + 1
    xp = jnp.pad(x_nhwc, ((0, 0), (1, 1), (1, 1), (0, 0)))
    patches = []
    for kh in range(3):
        for kw in range(3):
            patches.append(
                xp[:, kh:kh + stride * (Ho - 1) + 1:stride,
                      kw:kw + stride * (Wo - 1) + 1:stride, :])
    cols = jnp.concatenate(patches, axis=-1)  # (N, Ho, Wo, 9*C)
    return cols.reshape(N * Ho * Wo, 9 * C), (N, Ho, Wo)


def _w3x3_to_mat(w_oihw):
    Cout, Cin = w_oihw.shape[0], w_oihw.shape[1]
    return jnp.transpose(w_oihw, (2, 3, 1, 0)).reshape(9 * Cin, Cout)


def _fold_bn(gamma, beta, mean, var, eps=_EPS):
    scale = gamma / jnp.sqrt(var + eps)
    bias = beta - mean * scale
    return scale, bias


@functools.partial(jax.jit, static_argnames=("stride",))
def basic_block_forward(x_nchw, p, *, stride):
    # Cast to bf16 BEFORE im2col so the 9x-expanded patches are bf16 in HBM.
    x = jnp.transpose(x_nchw, (0, 2, 3, 1)).astype(jnp.bfloat16)  # NHWC
    N, H, W, Cin = x.shape
    Cout = p["conv1_w"].shape[0]

    # conv1 -> bn1 -> relu   (BN scale folded into the weight matrix, f32 fold)
    cols1, (_, Ho, Wo) = _im2col_3x3(x, stride)
    s1, b1 = _fold_bn(p["bn1_gamma"], p["bn1_beta"], p["bn1_mean"], p["bn1_var"])
    w1s = _w3x3_to_mat(p["conv1_w"]) * s1[None, :]
    out1 = matmul_bn_act(cols1, w1s, b1, relu=True, out_dtype=jnp.bfloat16)
    out1_nhwc = out1.reshape(N, Ho, Wo, Cout)

    # conv2 -> bn2 -> (+ shortcut) -> relu, fused per output tile.
    cols2, _ = _im2col_3x3(out1_nhwc, 1)
    s2, b2 = _fold_bn(p["bn2_gamma"], p["bn2_beta"], p["bn2_mean"], p["bn2_var"])
    w2s = _w3x3_to_mat(p["conv2_w"]) * s2[None, :]

    if stride != 1 or Cin != Cout:
        # projection shortcut: 1x1 conv (stride) + BN, fused into the kernel.
        xs = x[:, ::stride, ::stride, :].reshape(N * Ho * Wo, Cin)
        ss, bs = _fold_bn(p["sc_gamma"], p["sc_beta"], p["sc_mean"], p["sc_var"])
        wss = jnp.transpose(p["sc_w"], (2, 3, 1, 0)).reshape(Cin, Cout) * ss[None, :]
        out = matmul_bn_proj_add_relu(cols2, w2s, b2 + bs, xs, wss,
                                      out_dtype=jnp.float32)
    else:
        # identity shortcut: residual added per output tile (bf16 stream).
        res = x.reshape(N * Ho * Wo, Cout)
        out = matmul_bn_add_relu_identity(cols2, w2s, b2, res,
                                          out_dtype=jnp.float32)

    out = out.reshape(N, Ho, Wo, Cout)
    return jnp.transpose(out, (0, 3, 1, 2))  # back to NCHW


# --------------------------- plain-JAX reference ---------------------------

def _reference(x_nchw, p, stride, eps=_EPS):
    def conv(x, w, s, pad):
        return lax.conv_general_dilated(
            x, w, (s, s), [(pad, pad), (pad, pad)],
            dimension_numbers=("NCHW", "OIHW", "NCHW"))

    def bn(x, g, b, m, v):
        g, b, m, v = (t[None, :, None, None] for t in (g, b, m, v))
        return g * (x - m) / jnp.sqrt(v + eps) + b

    out = jax.nn.relu(bn(conv(x_nchw, p["conv1_w"], stride, 1),
                         p["bn1_gamma"], p["bn1_beta"], p["bn1_mean"], p["bn1_var"]))
    out = bn(conv(out, p["conv2_w"], 1, 1),
             p["bn2_gamma"], p["bn2_beta"], p["bn2_mean"], p["bn2_var"])
    Cin, Cout = x_nchw.shape[1], p["conv1_w"].shape[0]
    if stride != 1 or Cin != Cout:
        sc = bn(conv(x_nchw, p["sc_w"], stride, 0),
                p["sc_gamma"], p["sc_beta"], p["sc_mean"], p["sc_var"])
    else:
        sc = x_nchw
    return jax.nn.relu(sc + out)


# ---------------------------------- main -----------------------------------

def _make_params(key, in_planes, planes):
    ks = jax.random.split(key, 8)
    return {
        "conv1_w": 0.1 * jax.random.normal(ks[0], (planes, in_planes, 3, 3), jnp.float32),
        "conv2_w": 0.1 * jax.random.normal(ks[1], (planes, planes, 3, 3), jnp.float32),
        "bn1_gamma": 1.0 + 0.1 * jax.random.normal(ks[2], (planes,), jnp.float32),
        "bn1_beta": 0.05 * jax.random.normal(ks[3], (planes,), jnp.float32),
        "bn1_mean": 0.1 * jax.random.normal(ks[4], (planes,), jnp.float32),
        "bn1_var": 0.5 + jax.nn.softplus(jax.random.normal(ks[5], (planes,), jnp.float32)),
        "bn2_gamma": 1.0 + 0.1 * jax.random.normal(ks[6], (planes,), jnp.float32),
        "bn2_beta": 0.05 * jax.random.normal(ks[7], (planes,), jnp.float32),
        "bn2_mean": jnp.linspace(-0.2, 0.2, planes, dtype=jnp.float32),
        "bn2_var": jnp.linspace(0.5, 1.5, planes, dtype=jnp.float32),
        # shortcut (1x1 conv stride + bn) — used when stride != 1 or channel change
        "sc_w": 0.1 * jax.random.normal(jax.random.fold_in(key, 99),
                                        (planes, in_planes, 1, 1), jnp.float32),
        "sc_gamma": jnp.linspace(0.9, 1.1, planes, dtype=jnp.float32),
        "sc_beta": jnp.linspace(-0.1, 0.1, planes, dtype=jnp.float32),
        "sc_mean": jnp.linspace(-0.05, 0.05, planes, dtype=jnp.float32),
        "sc_var": jnp.linspace(0.8, 1.2, planes, dtype=jnp.float32),
    }


if __name__ == "__main__":
    # Case 1: projection shortcut (stride=2, channel change) — fused path.
    in_planes, planes, stride = 4, 8, 2
    kx, kp = jax.random.split(jax.random.PRNGKey(0))
    x = jax.random.normal(kx, (2, in_planes, 16, 16), jnp.float32)  # NCHW
    params = _make_params(kp, in_planes, planes)

    out = jax.block_until_ready(basic_block_forward(x, params, stride=stride))
    ref = jax.block_until_ready(_reference(x, params, stride))
    assert out.shape == ref.shape == (2, planes, 8, 8), (out.shape, ref.shape)
    # bf16 MXU operands / bf16 activation & residual streams (f32 accumulation)
    # -> loosened tolerance vs the f32 reference.
    assert jnp.allclose(out, ref, atol=5e-2, rtol=3e-2), float(
        jnp.max(jnp.abs(out - ref)))

    # Case 2: identity shortcut (stride=1, same channels).
    kx2, kp2 = jax.random.split(jax.random.PRNGKey(1))
    x2 = jax.random.normal(kx2, (2, 8, 8, 8), jnp.float32)  # NCHW
    params2 = _make_params(kp2, 8, 8)
    out2 = jax.block_until_ready(basic_block_forward(x2, params2, stride=1))
    ref2 = jax.block_until_ready(_reference(x2, params2, 1))
    assert out2.shape == ref2.shape == (2, 8, 8, 8), (out2.shape, ref2.shape)
    assert jnp.allclose(out2, ref2, atol=5e-2, rtol=3e-2), float(
        jnp.max(jnp.abs(out2 - ref2)))

    print("KERNEL_OK")
</pallas_src>

<mosaic_0001>
module attributes {stable_mosaic.version = 11 : i64} {
  func.func @_mm_bias_kernel(%arg0: i32, %arg1: i32, %arg2: memref<128x128xbf16, #tpu.memory_space<vmem>>, %arg3: memref<128x128xbf16, #tpu.memory_space<vmem>>, %arg4: memref<1x128xf32, #tpu.memory_space<vmem>>, %arg5: memref<128x128xbf16, #tpu.memory_space<vmem>>) attributes {dimension_semantics = [#tpu.dimension_semantics<parallel>, #tpu.dimension_semantics<parallel>], iteration_bounds = array<i64: 1, 1>, scalar_prefetch = 0 : i64, scratch_operands = 0 : i64, tpu.core_type = #tpu.core_type<tc>, window_params = [{transform_indices = @transform_0, window_bounds = array<i64: 128, 128>}, {transform_indices = @transform_1, window_bounds = array<i64: 128, 128>}, {transform_indices = @transform_2, window_bounds = array<i64: 1, 128>}, {transform_indices = @transform_3, window_bounds = array<i64: 128, 128>}]} {
    %c0 = arith.constant 0 : index
    %c0_0 = arith.constant 0 : index
    %0 = vector.load %arg2[%c0, %c0_0] : memref<128x128xbf16, #tpu.memory_space<vmem>>, vector<128x128xbf16>
    %c0_1 = arith.constant 0 : index
    %c0_2 = arith.constant 0 : index
    %1 = vector.load %arg3[%c0_1, %c0_2] : memref<128x128xbf16, #tpu.memory_space<vmem>>, vector<128x128xbf16>
    %cst = arith.constant dense<0.000000e+00> : vector<128x128xf32>
    %2 = tpu.matmul %0, %1, %cst {dimension_numbers = #tpu.dot_dimension_numbers<[1], [0], [0], [1], [0, 0, 1, 1], [], []>} : vector<128x128xbf16>, vector<128x128xbf16>, vector<128x128xf32> -> vector<128x128xf32>
    %c0_3 = arith.constant 0 : index
    %c0_4 = arith.constant 0 : index
    %3 = vector.load %arg4[%c0_3, %c0_4] : memref<1x128xf32, #tpu.memory_space<vmem>>, vector<1x128xf32>
    %4 = vector.broadcast %3 : vector<1x128xf32> to vector<128x128xf32>
    %5 = arith.addf %2, %4 : vector<128x128xf32>
    %cst_5 = arith.constant 0.000000e+00 : f32
    %6 = vector.broadcast %cst_5 : f32 to vector<128x128xf32>
    %7 = arith.maximumf %5, %6 : vector<128x128xf32>
    %8 = arith.truncf %7 : vector<128x128xf32> to vector<128x128xbf16>
    %c0_6 = arith.constant 0 : index
    %c0_7 = arith.constant 0 : index
    %9 = vector.load %arg5[%c0_6, %c0_7] : memref<128x128xbf16, #tpu.memory_space<vmem>>, vector<128x128xbf16>
    tpu.vector_store %arg5[%c0_6, %c0_7], %8 {strides = array<i32>} : memref<128x128xbf16, #tpu.memory_space<vmem>>, vector<128x128xbf16>,
    return
  }
  func.func @transform_0(%arg0: i32, %arg1: i32) -> (i32, i32) {
    %c0_i32 = arith.constant 0 : i32
    %c0_i32_0 = arith.constant 0 : i32
    return %arg0, %c0_i32 : i32, i32
  }
  func.func @transform_1(%arg0: i32, %arg1: i32) -> (i32, i32) {
    %c0_i32 = arith.constant 0 : i32
    %c0_i32_0 = arith.constant 0 : i32
    return %c0_i32, %arg1 : i32, i32
  }
  func.func @transform_2(%arg0: i32, %arg1: i32) -> (i32, i32) {
    %c0_i32 = arith.constant 0 : i32
    %c0_i32_0 = arith.constant 0 : i32
    return %c0_i32, %arg1 : i32, i32
  }
  func.func @transform_3(%arg0: i32, %arg1: i32) -> (i32, i32) {
    %c0_i32 = arith.constant 0 : i32
    return %arg0, %arg1 : i32, i32
  }
}

module attributes {stable_mosaic.version = 11 : i64} {
  func.func @_mm_bias_proj_relu_kernel(%arg0: i32, %arg1: i32, %arg2: memref<128x128xbf16, #tpu.memory_space<vmem>>, %arg3: memref<128x128xbf16, #tpu.memory_space<vmem>>, %arg4: memref<1x128xf32, #tpu.memory_space<vmem>>, %arg5: memref<128x128xbf16, #tpu.memory_space<vmem>>, %arg6: memref<128x128xbf16, #tpu.memory_space<vmem>>, %arg7: memref<128x128xf32, #tpu.memory_space<vmem>>) attributes {dimension_semantics = [#tpu.dimension_semantics<parallel>, #tpu.dimension_semantics<parallel>], iteration_bounds = array<i64: 1, 1>, scalar_prefetch = 0 : i64, scratch_operands = 0 : i64, tpu.core_type = #tpu.core_type<tc>, window_params = [{transform_indices = @transform_0, window_bounds = array<i64: 128, 128>}, {transform_indices = @transform_1, window_bounds = array<i64: 128, 128>}, {transform_indices = @transform_2, window_bounds = array<i64: 1, 128>}, {transform_indices = @transform_3, window_bounds = array<i64: 128, 128>}, {transform_indices = @transform_4, window_bounds = array<i64: 128, 128>}, {transform_indices = @transform_5, window_bounds = array<i64: 128, 128>}]} {
    %c0 = arith.constant 0 : index
    %c0_0 = arith.constant 0 : index
    %0 = vector.load %arg2[%c0, %c0_0] : memref<128x128xbf16, #tpu.memory_space<vmem>>, vector<128x128xbf16>
    %c0_1 = arith.constant 0 : index
    %c0_2 = arith.constant 0 : index
    %1 = vector.load %arg3[%c0_1, %c0_2] : memref<128x128xbf16, #tpu.memory_space<vmem>>, vector<128x128xbf16>
    %cst = arith.constant dense<0.000000e+00> : vector<128x128xf32>
    %2 = tpu.matmul %0, %1, %cst {dimension_numbers = #tpu.dot_dimension_numbers<[1], [0], [0], [1], [0, 0, 1, 1], [], []>} : vector<128x128xbf16>, vector<128x128xbf16>, vector<128x128xf32> -> vector<128x128xf32>
    %c0_3 = arith.constant 0 : index
    %c0_4 = arith.constant 0 : index
    %3 = vector.load %arg5[%c0_3, %c0_4] : memref<128x128xbf16, #tpu.memory_space<vmem>>, vector<128x128xbf16>
    %c0_5 = arith.constant 0 : index
    %c0_6 = arith.constant 0 : index
    %4 = vector.load %arg6[%c0_5, %c0_6] : memref<128x128xbf16, #tpu.memory_space<vmem>>, vector<128x128xbf16>
    %cst_7 = arith.constant dense<0.000000e+00> : vector<128x128xf32>
    %5 = tpu.matmul %3, %4, %cst_7 {dimension_numbers = #tpu.dot_dimension_numbers<[1], [0], [0], [1], [0, 0, 1, 1], [], []>} : vector<128x128xbf16>, vector<128x128xbf16>, vector<128x128xf32> -> vector<128x128xf32>
    %6 = arith.addf %2, %5 : vector<128x128xf32>
    %c0_8 = arith.constant 0 : index
    %c0_9 = arith.constant 0 : index
    %7 = vector.load %arg4[%c0_8, %c0_9] : memref<1x128xf32, #tpu.memory_space<vmem>>, vector<1x128xf32>
    %8 = vector.broadcast %7 : vector<1x128xf32> to vector<128x128xf32>
    %9 = arith.addf %6, %8 : vector<128x128xf32>
    %cst_10 = arith.constant 0.000000e+00 : f32
    %10 = vector.broadcast %cst_10 : f32 to vector<128x128xf32>
    %11 = arith.maximumf %9, %10 : vector<128x128xf32>
    %c0_11 = arith.constant 0 : index
    %c0_12 = arith.constant 0 : index
    %12 = vector.load %arg7[%c0_11, %c0_12] : memref<128x128xf32, #tpu.memory_space<vmem>>, vector<128x128xf32>
    tpu.vector_store %arg7[%c0_11, %c0_12], %11 {strides = array<i32>} : memref<128x128xf32, #tpu.memory_space<vmem>>, vector<128x128xf32>,
    return
  }
  func.func @transform_0(%arg0: i32, %arg1: i32) -> (i32, i32) {
    %c0_i32 = arith.constant 0 : i32
    %c0_i32_0 = arith.constant 0 : i32
    return %arg0, %c0_i32 : i32, i32
  }
  func.func @transform_1(%arg0: i32, %arg1: i32) -> (i32, i32) {
    %c0_i32 = arith.constant 0 : i32
    %c0_i32_0 = arith.constant 0 : i32
    return %c0_i32, %arg1 : i32, i32
  }
  func.func @transform_2(%arg0: i32, %arg1: i32) -> (i32, i32) {
    %c0_i32 = arith.constant 0 : i32
    %c0_i32_0 = arith.constant 0 : i32
    return %c0_i32, %arg1 : i32, i32
  }
  func.func @transform_3(%arg0: i32, %arg1: i32) -> (i32, i32) {
    %c0_i32 = arith.constant 0 : i32
    %c0_i32_0 = arith.constant 0 : i32
    return %arg0, %c0_i32 : i32, i32
  }
  func.func @transform_4(%arg0: i32, %arg1: i32) -> (i32, i32) {
    %c0_i32 = arith.constant 0 : i32
    %c0_i32_0 = arith.constant 0 : i32
    return %c0_i32, %arg1 : i32, i32
  }
  func.func @transform_5(%arg0: i32, %arg1: i32) -> (i32, i32) {
    %c0_i32 = arith.constant 0 : i32
    return %arg0, %arg1 : i32, i32
  }
}

</mosaic_0001>

<bundles_post_ra>
// kernel: basic_block_forward.2
= control target key start
LH: loop header
LB: loop body
LE: loop exit
PB: predicated region body
PF: predicated region fallthrough
CT: control target
= control target key end

     0   :  { %s618_s1 = inlined_call_operand.vmem [shape: bf16[128,128], index: 1, kind: input, shape index: {}]   ;;  %s619_s0 = inlined_call_operand.vmem [shape: bf16[128,128], index: 0, kind: input, shape index: {}]   ;;  %s620_s2 = inlined_call_operand.vmem [shape: f32[1,128], index: 2, kind: input, shape index: {}]   ;;  %s621_s3 = inlined_call_operand.vmem [shape: bf16[128,128], index: 3, kind: output, shape index: {}]  }
   0x1   :  { %v507_v0 = vld [vmem:[%s618_s1] sm:$0xff]   ;;  %v508_v1 = vld [vmem:[%s618_s1 + $0x8] sm:$0xff]   ;;  %v509_v2 = vld [vmem:[%s618_s1 + $0x10] sm:$0xff]  }
   0x2   :  { %459 = vmatprep.subr.bf16.mxu0 %v507_v0  ;;  %491 = vmatprep.subr.bf16.mxu1 %v507_v0  ;;  %v510_v3 = vld [vmem:[%s618_s1 + $0x18] sm:$0xff]   ;;  %v515_v4 = vld [vmem:[%s619_s0] sm:$0xff]   ;;  %v512_v7 = vld [vmem:[%s618_s1 + $0x28] sm:$0xff]  }
   0x3   :  { %460 = vmatpush3.bf16.msra.mxu0 %v507_v0  ;;  %499 = vmatpush3.bf16.msra.mxu1 %v507_v0  ;;  %v516_v5 = vld [vmem:[%s619_s0 + $0x20] sm:$0xff]   ;;  %v513_v8 = vld [vmem:[%s618_s1 + $0x30] sm:$0xff]   ;;  %v514_v9 = vld [vmem:[%s618_s1 + $0x38] sm:$0xff]  }
   0x4   :  { %461 = vmatprep.subr.bf16.mxu0 %v508_v1  ;;  %492 = vmatprep.subr.bf16.mxu1 %v508_v1  ;;  %v511_v6 = vld [vmem:[%s618_s1 + $0x20] sm:$0xff]   ;;  %v517_v10 = vld [vmem:[%s619_s0 + $0x8] sm:$0xff]   ;;  %v519_v12 = vld [vmem:[%s619_s0 + $0x10] sm:$0xff]  }
   0x5   :  { %475 = vmatprep.mubr.bf16.mxu0 %v515_v4  ;;  %483 = vmatprep.mubr.bf16.mxu1 %v516_v5  ;;  %v518_v11 = vld [vmem:[%s619_s0 + $0x28] sm:$0xff]   ;;  %v520_v13 = vld [vmem:[%s619_s0 + $0x30] sm:$0xff]   ;;  %v521_v14 = vld [vmem:[%s619_s0 + $0x18] sm:$0xff]  }
   0x6   :  { %v522_v15 = vld [vmem:[%s619_s0 + $0x38] sm:$0xff]   ;;  %v347_v16 = vld [vmem:[%s620_s2] ss:$0 sm:$0xff] }
   0x7   :  { %462 = vmatpush3.bf16.msra.mxu0 %v508_v1  ;;  %500 = vmatpush3.bf16.msra.mxu1 %v508_v1 }
   0x8   :  { %463 = vmatprep.subr.bf16.mxu0 %v509_v2  ;;  %493 = vmatprep.subr.bf16.mxu1 %v509_v2 }
   0xb   :  { %464 = vmatpush3.bf16.msra.mxu0 %v509_v2  ;;  %501 = vmatpush3.bf16.msra.mxu1 %v509_v2 }
   0xc   :  { %465 = vmatprep.subr.bf16.mxu0 %v510_v3  ;;  %494 = vmatprep.subr.bf16.mxu1 %v510_v3 }
   0xf   :  { %466 = vmatpush3.bf16.msra.mxu0 %v510_v3  ;;  %502 = vmatpush3.bf16.msra.mxu1 %v510_v3 }
  0x10   :  { %467 = vmatprep.subr.bf16.mxu0 %v511_v6  ;;  %495 = vmatprep.subr.bf16.mxu1 %v511_v6 }
  0x13   :  { %468 = vmatpush3.bf16.msra.mxu0 %v511_v6  ;;  %503 = vmatpush3.bf16.msra.mxu1 %v511_v6 }
  0x14   :  { %469 = vmatprep.subr.bf16.mxu0 %v512_v7  ;;  %496 = vmatprep.subr.bf16.mxu1 %v512_v7 }
  0x17   :  { %470 = vmatpush3.bf16.msra.mxu0 %v512_v7  ;;  %504 = vmatpush3.bf16.msra.mxu1 %v512_v7 }
  0x18   :  { %471 = vmatprep.subr.bf16.mxu0 %v513_v8  ;;  %497 = vmatprep.subr.bf16.mxu1 %v513_v8 }
  0x1b   :  { %472 = vmatpush3.bf16.msra.mxu0 %v513_v8  ;;  %505 = vmatpush3.bf16.msra.mxu1 %v513_v8 }
  0x1c   :  { %473 = vmatprep.subr.bf16.mxu0 %v514_v9  ;;  %498 = vmatprep.subr.bf16.mxu1 %v514_v9 }
  0x1f   :  { %474 = vmatpush3.bf16.msra.mxu0 %v514_v9  ;;  %506 = vmatpush3.bf16.msra.mxu1 %v514_v9 }
  0x22   :  { %476 = vmatmul.mubr.bf16.vlgmr.msra.gmra.mrb[0].mxu0 %v517_v10  ;;  %484 = vmatmul.mubr.bf16.vlgmr.msra.gmra.mrb[0].mxu1 %v518_v11 }
  0x23   :  { %479 = vmatprep.mubr.bf16.mxu0 %v519_v12  ;;  %487 = vmatprep.mubr.bf16.mxu1 %v520_v13 }
  0x2a   :  { %480 = vmatmul.mubr.bf16.gmra.mrb[4].mxu0 %v521_v14  ;;  %488 = vmatmul.mubr.bf16.gmra.mrb[4].mxu1 %v522_v15 }
  0xf5   :  { %v477_v17 = vpop.f32.mrb[0].mxu0  ;;  %v485_v18 = vpop.f32.mrb[0].mxu1 }
  0xf6   :  { %v193_v19 = vadd.f32 %v477_v17, %v347_v16  ;;  %v225_v20 = vadd.f32 %v485_v18, %v347_v16  ;;  %v184_v21 = vpop.f32.mrb[1].mxu0  ;;  %v216_v22 = vpop.f32.mrb[1].mxu1 }
  0xf7   :  { %v185_v23 = vadd.f32 %v347_v16, %v184_v21  ;;  %v217_v24 = vadd.f32 %v347_v16, %v216_v22  ;;  %v478_v25 = vpop.f32.mrb[2].mxu0  ;;  %v486_v26 = vpop.f32.mrb[2].mxu1 }
  0xf8   :  { %v196_v27 = vadd.f32 %v478_v25, %v347_v16  ;;  %v228_v28 = vadd.f32 %v486_v26, %v347_v16  ;;  %v187_v29 = vpop.f32.mrb[3].mxu0  ;;  %v219_v30 = vpop.f32.mrb[3].mxu1  ;;  %v249_v33 = vmax.f32 %v193_v19, 0.0  ;;  %v257_v34 = vmax.f32 %v225_v20, 0.0 }
  0xf9   :  { %v188_v31 = vadd.f32 %v347_v16, %v187_v29  ;;  %v220_v32 = vadd.f32 %v347_v16, %v219_v30  ;;  %v247_v37 = vmax.f32 %v185_v23, 0.0  ;;  %v255_v38 = vmax.f32 %v217_v24, 0.0 }
  0xfa   :  { %v250_v35 = vmax.f32 %v196_v27, 0.0  ;;  %v258_v36 = vmax.f32 %v228_v28, 0.0 }
  0xfb   :  { %v248_v39 = vmax.f32 %v188_v31, 0.0  ;;  %v256_v40 = vmax.f32 %v220_v32, 0.0 }
  0xfc   :  { %v404_v41 = vpack.c.bf16 %v250_v35, %v249_v33  ;;  %v424_v42 = vpack.c.bf16 %v258_v36, %v257_v34 }
  0xfd   :  { %v399_v43 = vpack.c.bf16 %v248_v39, %v247_v37  ;;  %v419_v44 = vpack.c.bf16 %v256_v40, %v255_v38  ;;  %v481_v45 = vpop.f32.mrb[4].mxu0  ;;  %v489_v46 = vpop.f32.mrb[4].mxu1 }
  0xfe   :  { %436 = vst [vmem:[%s621_s3 + $0x8] sm:$0xff] %v404_v41   ;;  %440 = vst [vmem:[%s621_s3 + $0x28] sm:$0xff] %v424_v42   ;;  %v209_v47 = vadd.f32 %v481_v45, %v347_v16  ;;  %v241_v48 = vadd.f32 %v489_v46, %v347_v16  ;;  %v200_v49 = vpop.f32.mrb[5].mxu0  ;;  %v232_v50 = vpop.f32.mrb[5].mxu1 }
  0xff   :  { %400 = vst [vmem:[%s621_s3] sm:$0xff] %v399_v43   ;;  %439 = vst [vmem:[%s621_s3 + $0x20] sm:$0xff] %v419_v44   ;;  %v201_v51 = vadd.f32 %v347_v16, %v200_v49  ;;  %v233_v52 = vadd.f32 %v347_v16, %v232_v50  ;;  %v482_v53 = vpop.f32.mrb[6].mxu0  ;;  %v490_v54 = vpop.f32.mrb[6].mxu1 }
 0x100   :  { %v212_v55 = vadd.f32 %v482_v53, %v347_v16  ;;  %v244_v56 = vadd.f32 %v490_v54, %v347_v16  ;;  %v203_v57 = vpop.f32.mrb[7].mxu0  ;;  %v235_v58 = vpop.f32.mrb[7].mxu1  ;;  %v253_v61 = vmax.f32 %v209_v47, 0.0  ;;  %v261_v62 = vmax.f32 %v241_v48, 0.0 }
 0x101   :  { %v204_v59 = vadd.f32 %v347_v16, %v203_v57  ;;  %v236_v60 = vadd.f32 %v347_v16, %v235_v58  ;;  %v251_v1 = vmax.f32 %v201_v51, 0.0  ;;  %v259_v2 = vmax.f32 %v233_v52, 0.0 }
 0x102   :  { %v254_v63 = vmax.f32 %v212_v55, 0.0  ;;  %v262_v0 = vmax.f32 %v244_v56, 0.0 }
 0x103   :  { %v252_v3 = vmax.f32 %v204_v59, 0.0  ;;  %v260_v4 = vmax.f32 %v236_v60, 0.0 }
 0x104   :  { %v414_v5 = vpack.c.bf16 %v254_v63, %v253_v61  ;;  %v434_v6 = vpack.c.bf16 %v262_v0, %v261_v62 }
 0x105   :  { %v409_v7 = vpack.c.bf16 %v252_v3, %v251_v1  ;;  %v429_v8 = vpack.c.bf16 %v260_v4, %v259_v2 }
 0x106   :  { %438 = vst [vmem:[%s621_s3 + $0x18] sm:$0xff] %v414_v5   ;;  %442 = vst [vmem:[%s621_s3 + $0x38] sm:$0xff] %v434_v6  }
 0x107   :  { %437 = vst [vmem:[%s621_s3 + $0x10] sm:$0xff] %v409_v7   ;;  %441 = vst [vmem:[%s621_s3 + $0x30] sm:$0xff] %v429_v8  }

// kernel: basic_block_forward.3
= control target key start
LH: loop header
LB: loop body
LE: loop exit
PB: predicated region body
PF: predicated region fallthrough
CT: control target
= control target key end

     0   :  { %s902_s4 = inlined_call_operand.vmem [shape: bf16[128,128], index: 4, kind: input, shape index: {}]   ;;  %s903_s1 = inlined_call_operand.vmem [shape: bf16[128,128], index: 1, kind: input, shape index: {}]   ;;  %s904_s3 = inlined_call_operand.vmem [shape: bf16[128,128], index: 3, kind: input, shape index: {}]   ;;  %s905_s0 = inlined_call_operand.vmem [shape: bf16[128,128], index: 0, kind: input, shape index: {}]   ;;  %s906_s2 = inlined_call_operand.vmem [shape: f32[1,128], index: 2, kind: input, shape index: {}]   ;;  %s907_s5 = inlined_call_operand.vmem [shape: f32[128,128], index: 5, kind: output, shape index: {}]  }
   0x1   :  { %v675_v0 = vld [vmem:[%s902_s4] sm:$0xff]   ;;  %v677_v2 = vld [vmem:[%s902_s4 + $0x8] sm:$0xff]   ;;  %v679_v4 = vld [vmem:[%s902_s4 + $0x10] sm:$0xff]  }
   0x2   :  { %v676_v1 = vld [vmem:[%s903_s1] sm:$0xff]   ;;  %595 = vmatprep.subr.bf16.mxu1 %v675_v0  ;;  %v678_v3 = vld [vmem:[%s903_s1 + $0x8] sm:$0xff]   ;;  %v680_v5 = vld [vmem:[%s903_s1 + $0x10] sm:$0xff]  }
   0x3   :  { %627 = vmatprep.subr.bf16.mxu0 %v676_v1  ;;  %596 = vmatpush3.bf16.msra.mxu1 %v675_v0  ;;  %v681_v6 = vld [vmem:[%s902_s4 + $0x18] sm:$0xff]   ;;  %v683_v8 = vld [vmem:[%s902_s4 + $0x20] sm:$0xff]   ;;  %v685_v10 = vld [vmem:[%s902_s4 + $0x28] sm:$0xff]  }
   0x4   :  { %628 = vmatpush3.bf16.msra.mxu0 %v676_v1  ;;  %597 = vmatprep.subr.bf16.mxu1 %v677_v2  ;;  %v682_v7 = vld [vmem:[%s903_s1 + $0x18] sm:$0xff]   ;;  %v684_v9 = vld [vmem:[%s903_s1 + $0x20] sm:$0xff]   ;;  %v686_v11 = vld [vmem:[%s903_s1 + $0x28] sm:$0xff]  }
   0x5   :  { %629 = vmatprep.subr.bf16.mxu0 %v678_v3  ;;  %v691_v12 = vld [vmem:[%s904_s3] sm:$0xff]   ;;  %v687_v14 = vld [vmem:[%s902_s4 + $0x30] sm:$0xff]   ;;  %v689_v16 = vld [vmem:[%s902_s4 + $0x38] sm:$0xff]  }
   0x6   :  { %v692_v13 = vld [vmem:[%s905_s0] sm:$0xff]   ;;  %611 = vmatprep.mubr.bf16.mxu1 %v691_v12  ;;  %v688_v15 = vld [vmem:[%s903_s1 + $0x30] sm:$0xff]   ;;  %v690_v17 = vld [vmem:[%s903_s1 + $0x38] sm:$0xff]  }
   0x7   :  { %598 = vmatpush3.bf16.msra.mxu1 %v677_v2  ;;  %643 = vmatprep.mubr.bf16.mxu0 %v692_v13  ;;  %v693_v18 = vld [vmem:[%s904_s3 + $0x8] sm:$0xff]   ;;  %v695_v20 = vld [vmem:[%s904_s3 + $0x10] sm:$0xff]   ;;  %v697_v22 = vld [vmem:[%s904_s3 + $0x18] sm:$0xff]  }
   0x8   :  { %630 = vmatpush3.bf16.msra.mxu0 %v678_v3  ;;  %599 = vmatprep.subr.bf16.mxu1 %v679_v4  ;;  %v694_v19 = vld [vmem:[%s905_s0 + $0x8] sm:$0xff]   ;;  %v696_v21 = vld [vmem:[%s905_s0 + $0x10] sm:$0xff]   ;;  %v698_v23 = vld [vmem:[%s905_s0 + $0x18] sm:$0xff]  }
   0x9   :  { %631 = vmatprep.subr.bf16.mxu0 %v680_v5  ;;  %v699_v24 = vld [vmem:[%s904_s3 + $0x20] sm:$0xff]   ;;  %v701_v26 = vld [vmem:[%s904_s3 + $0x28] sm:$0xff]   ;;  %v703_v28 = vld [vmem:[%s904_s3 + $0x30] sm:$0xff]  }
   0xa   :  { %v700_v25 = vld [vmem:[%s905_s0 + $0x20] sm:$0xff]   ;;  %v702_v27 = vld [vmem:[%s905_s0 + $0x28] sm:$0xff]   ;;  %v704_v29 = vld [vmem:[%s905_s0 + $0x30] sm:$0xff]  }
   0xb   :  { %600 = vmatpush3.bf16.msra.mxu1 %v679_v4  ;;  %v705_v30 = vld [vmem:[%s904_s3 + $0x38] sm:$0xff]   ;;  %v836_v34 = vld [vmem:[%s906_s2] ss:$0 sm:$0xff] }
   0xc   :  { %632 = vmatpush3.bf16.msra.mxu0 %v680_v5  ;;  %601 = vmatprep.subr.bf16.mxu1 %v681_v6  ;;  %v706_v31 = vld [vmem:[%s905_s0 + $0x38] sm:$0xff]  }
   0xd   :  { %633 = vmatprep.subr.bf16.mxu0 %v682_v7 }
   0xf   :  { %602 = vmatpush3.bf16.msra.mxu1 %v681_v6 }
  0x10   :  { %634 = vmatpush3.bf16.msra.mxu0 %v682_v7  ;;  %603 = vmatprep.subr.bf16.mxu1 %v683_v8 }
  0x11   :  { %635 = vmatprep.subr.bf16.mxu0 %v684_v9 }
  0x13   :  { %604 = vmatpush3.bf16.msra.mxu1 %v683_v8 }
  0x14   :  { %636 = vmatpush3.bf16.msra.mxu0 %v684_v9  ;;  %605 = vmatprep.subr.bf16.mxu1 %v685_v10 }
  0x15   :  { %637 = vmatprep.subr.bf16.mxu0 %v686_v11 }
  0x17   :  { %606 = vmatpush3.bf16.msra.mxu1 %v685_v10 }
  0x18   :  { %638 = vmatpush3.bf16.msra.mxu0 %v686_v11  ;;  %607 = vmatprep.subr.bf16.mxu1 %v687_v14 }
  0x19   :  { %639 = vmatprep.subr.bf16.mxu0 %v688_v15 }
  0x1b   :  { %608 = vmatpush3.bf16.msra.mxu1 %v687_v14 }
  0x1c   :  { %640 = vmatpush3.bf16.msra.mxu0 %v688_v15  ;;  %609 = vmatprep.subr.bf16.mxu1 %v689_v16 }
  0x1d   :  { %641 = vmatprep.subr.bf16.mxu0 %v690_v17 }
  0x1f   :  { %610 = vmatpush3.bf16.msra.mxu1 %v689_v16 }
  0x20   :  { %642 = vmatpush3.bf16.msra.mxu0 %v690_v17 }
  0x22   :  { %612 = vmatmul.mubr.bf16.vlgmr.msra.gmra.mrb[0].mxu1 %v693_v18 }
  0x23   :  { %644 = vmatmul.mubr.bf16.vlgmr.msra.gmra.mrb[0].mxu0 %v694_v19  ;;  %615 = vmatprep.mubr.bf16.mxu1 %v695_v20 }
  0x24   :  { %647 = vmatprep.mubr.bf16.mxu0 %v696_v21 }
  0x2a   :  { %616 = vmatmul.mubr.bf16.gmra.mrb[4].mxu1 %v697_v22 }
  0x2b   :  { %648 = vmatmul.mubr.bf16.gmra.mrb[4].mxu0 %v698_v23  ;;  %619 = vmatprep.mubr.bf16.mxu1 %v699_v24 }
  0x2c   :  { %651 = vmatprep.mubr.bf16.mxu0 %v700_v25 }
  0x32   :  { %620 = vmatmul.mubr.bf16.gmra.mrb[8].mxu1 %v701_v26 }
  0x33   :  { %652 = vmatmul.mubr.bf16.gmra.mrb[8].mxu0 %v702_v27  ;;  %623 = vmatprep.mubr.bf16.mxu1 %v703_v28 }
  0x34   :  { %655 = vmatprep.mubr.bf16.mxu0 %v704_v29 }
  0x3a   :  { %624 = vmatmul.mubr.bf16.gmra.mrb[12].mxu1 %v705_v30 }
  0x3b   :  { %656 = vmatmul.mubr.bf16.gmra.mrb[12].mxu0 %v706_v31 }
  0xf5   :  { %v613_v32 = vpop.f32.mrb[0].mxu1 }
  0xf6   :  { %v645_v33 = vpop.f32.mrb[0].mxu0  ;;  %v215_v35 = vpop.f32.mrb[1].mxu1 }
  0xf7   :  { %v417_v36 = vadd.f32 %v645_v33, %v613_v32  ;;  %v408_v37 = vpop.f32.mrb[1].mxu0  ;;  %v614_v38 = vpop.f32.mrb[2].mxu1 }
  0xf8   :  { %v409_v39 = vadd.f32 %v408_v37, %v215_v35  ;;  %v646_v40 = vpop.f32.mrb[2].mxu0  ;;  %v218_v41 = vpop.f32.mrb[3].mxu1 }
  0xf9   :  { %v480_v42 = vadd.f32 %v836_v34, %v417_v36  ;;  %v420_v43 = vadd.f32 %v646_v40, %v614_v38  ;;  %v411_v44 = vpop.f32.mrb[3].mxu0 }
  0xfa   :  { %v478_v45 = vadd.f32 %v836_v34, %v409_v39  ;;  %v412_v46 = vadd.f32 %v411_v44, %v218_v41 }
  0xfb   :  { %v496_v47 = vmax.f32 %v480_v42, 0.0  ;;  %v481_v48 = vadd.f32 %v836_v34, %v420_v43 }
  0xfc   :  { %v494_v49 = vmax.f32 %v478_v45, 0.0  ;;  %v479_v50 = vadd.f32 %v836_v34, %v412_v46 }
  0xfd   :  { %512 = vst [vmem:[%s907_s5 + $0x10] sm:$0xff] %v496_v47  ;;  %v497_v51 = vmax.f32 %v481_v48, 0.0  ;;  %v617_v52 = vpop.f32.mrb[4].mxu1 }
  0xfe   :  { %510 = vst [vmem:[%s907_s5] sm:$0xff] %v494_v49  ;;  %v495_v53 = vmax.f32 %v479_v50, 0.0  ;;  %v649_v54 = vpop.f32.mrb[4].mxu0  ;;  %v231_v55 = vpop.f32.mrb[5].mxu1 }
  0xff   :  { %513 = vst [vmem:[%s907_s5 + $0x18] sm:$0xff] %v497_v51  ;;  %v433_v56 = vadd.f32 %v649_v54, %v617_v52  ;;  %v424_v57 = vpop.f32.mrb[5].mxu0  ;;  %v618_v58 = vpop.f32.mrb[6].mxu1 }
 0x100   :  { %511 = vst [vmem:[%s907_s5 + $0x8] sm:$0xff] %v495_v53  ;;  %v425_v59 = vadd.f32 %v424_v57, %v231_v55  ;;  %v650_v60 = vpop.f32.mrb[6].mxu0  ;;  %v234_v61 = vpop.f32.mrb[7].mxu1 }
 0x101   :  { %v484_v62 = vadd.f32 %v836_v34, %v433_v56  ;;  %v436_v63 = vadd.f32 %v650_v60, %v618_v58  ;;  %v427_v0 = vpop.f32.mrb[7].mxu0 }
 0x102   :  { %v482_v1 = vadd.f32 %v836_v34, %v425_v59  ;;  %v428_v2 = vadd.f32 %v427_v0, %v234_v61 }
 0x103   :  { %v500_v3 = vmax.f32 %v484_v62, 0.0  ;;  %v485_v4 = vadd.f32 %v836_v34, %v436_v63 }
 0x104   :  { %v498_v5 = vmax.f32 %v482_v1, 0.0  ;;  %v483_v6 = vadd.f32 %v836_v34, %v428_v2 }
 0x105   :  { %516 = vst [vmem:[%s907_s5 + $0x30] sm:$0xff] %v500_v3  ;;  %v501_v7 = vmax.f32 %v485_v4, 0.0  ;;  %v621_v8 = vpop.f32.mrb[8].mxu1 }
 0x106   :  { %514 = vst [vmem:[%s907_s5 + $0x20] sm:$0xff] %v498_v5  ;;  %v499_v9 = vmax.f32 %v483_v6, 0.0  ;;  %v653_v10 = vpop.f32.mrb[8].mxu0  ;;  %v247_v11 = vpop.f32.mrb[9].mxu1 }
 0x107   :  { %517 = vst [vmem:[%s907_s5 + $0x38] sm:$0xff] %v501_v7  ;;  %v449_v12 = vadd.f32 %v653_v10, %v621_v8  ;;  %v440_v13 = vpop.f32.mrb[9].mxu0  ;;  %v622_v14 = vpop.f32.mrb[10].mxu1 }
 0x108   :  { %515 = vst [vmem:[%s907_s5 + $0x28] sm:$0xff] %v499_v9  ;;  %v441_v15 = vadd.f32 %v440_v13, %v247_v11  ;;  %v654_v16 = vpop.f32.mrb[10].mxu0  ;;  %v250_v17 = vpop.f32.mrb[11].mxu1 }
 0x109   :  { %v488_v18 = vadd.f32 %v836_v34, %v449_v12  ;;  %v452_v19 = vadd.f32 %v654_v16, %v622_v14  ;;  %v443_v20 = vpop.f32.mrb[11].mxu0 }
 0x10a   :  { %v486_v21 = vadd.f32 %v836_v34, %v441_v15  ;;  %v444_v22 = vadd.f32 %v443_v20, %v250_v17 }
 0x10b   :  { %v504_v23 = vmax.f32 %v488_v18, 0.0  ;;  %v489_v24 = vadd.f32 %v836_v34, %v452_v19 }
 0x10c   :  { %v502_v25 = vmax.f32 %v486_v21, 0.0  ;;  %v487_v26 = vadd.f32 %v836_v34, %v444_v22 }
 0x10d   :  { %520 = vst [vmem:[%s907_s5 + $0x50] sm:$0xff] %v504_v23  ;;  %v505_v27 = vmax.f32 %v489_v24, 0.0  ;;  %v625_v28 = vpop.f32.mrb[12].mxu1 }
 0x10e   :  { %518 = vst [vmem:[%s907_s5 + $0x40] sm:$0xff] %v502_v25  ;;  %v503_v29 = vmax.f32 %v487_v26, 0.0  ;;  %v657_v30 = vpop.f32.mrb[12].mxu0  ;;  %v263_v31 = vpop.f32.mrb[13].mxu1 }
 0x10f   :  { %521 = vst [vmem:[%s907_s5 + $0x58] sm:$0xff] %v505_v27  ;;  %v465_v32 = vadd.f32 %v657_v30, %v625_v28  ;;  %v456_v33 = vpop.f32.mrb[13].mxu0  ;;  %v626_v35 = vpop.f32.mrb[14].mxu1 }
 0x110   :  { %519 = vst [vmem:[%s907_s5 + $0x48] sm:$0xff] %v503_v29  ;;  %v457_v36 = vadd.f32 %v456_v33, %v263_v31  ;;  %v658_v37 = vpop.f32.mrb[14].mxu0  ;;  %v266_v38 = vpop.f32.mrb[15].mxu1 }
 0x111   :  { %v492_v39 = vadd.f32 %v836_v34, %v465_v32  ;;  %v468_v40 = vadd.f32 %v658_v37, %v626_v35  ;;  %v459_v41 = vpop.f32.mrb[15].mxu0 }
 0x112   :  { %v490_v42 = vadd.f32 %v836_v34, %v457_v36  ;;  %v460_v43 = vadd.f32 %v459_v41, %v266_v38 }
 0x113   :  { %v508_v44 = vmax.f32 %v492_v39, 0.0  ;;  %v493_v45 = vadd.f32 %v836_v34, %v468_v40 }
 0x114   :  { %v506_v46 = vmax.f32 %v490_v42, 0.0  ;;  %v491_v47 = vadd.f32 %v836_v34, %v460_v43 }
 0x115   :  { %524 = vst [vmem:[%s907_s5 + $0x70] sm:$0xff] %v508_v44  ;;  %v509_v48 = vmax.f32 %v493_v45, 0.0 }
 0x116   :  { %522 = vst [vmem:[%s907_s5 + $0x60] sm:$0xff] %v506_v46  ;;  %v507_v49 = vmax.f32 %v491_v47, 0.0 }
 0x117   :  { %525 = vst [vmem:[%s907_s5 + $0x78] sm:$0xff] %v509_v48 }
 0x118   :  { %523 = vst [vmem:[%s907_s5 + $0x68] sm:$0xff] %v507_v49 }

</bundles_post_ra>
